<compile_context>
chip_gen: v5e
topology: v5e:2x2
jax: 0.10.0
libtpu: 0.0.40
codegen_flags: <defaults>
</compile_context>

<pallas_src>
import functools

import numpy as np
import jax
import jax.numpy as jnp
from jax.experimental import pallas as pl
from jax.experimental.pallas import tpu as pltpu

_KH = _KW = 4   # pooling kernel (H, W); depth kernel is 1 -> D folds into plane batch
_SH = _SW = 4   # stride
_PH = _PW = 1   # zero padding
_G = 8          # planes packed per lane-dense row (sublane packing factor)


def _ceil_to(x, m):
    return -(-x // m) * m


def _pool_relu_kernel(x_ref, p_ref, o_ref):
    # x_ref: (TB, G*H*W) f32   p_ref: (G*H*W, G*Ho*Wo) bf16   o_ref: (TB, G*Ho*Wo) f32
    x = x_ref[...]
    p = p_ref[...]
    # 2x bf16 (hi+lo) split: ~f32 accuracy with two single-pass bf16 MXU matmuls
    # (P entries 0 / 0.0625 are exact in bf16; accumulation is f32).
    hi = x.astype(jnp.bfloat16)
    lo = (x - hi.astype(jnp.float32)).astype(jnp.bfloat16)
    y = jnp.dot(hi, p, preferred_element_type=jnp.float32)
    y = y + jnp.dot(lo, p, preferred_element_type=jnp.float32)
    o_ref[...] = jnp.maximum(y, 0.0).astype(o_ref.dtype)


@functools.lru_cache(maxsize=None)
def _pooling_matrix_np(H, W, Ho, Wo):
    """Block-diag pooling matrix (G*H*W, G*Ho*Wo): padding + 1/16 divisor folded in."""
    hh = np.arange(H)[None, :]
    hi = np.arange(Ho)[:, None]
    L = ((hh >= hi * _SH - _PH) & (hh < hi * _SH - _PH + _KH)).astype(np.float32)  # (Ho, H)
    ww = np.arange(W)[:, None]
    wj = np.arange(Wo)[None, :]
    R = ((ww >= wj * _SW - _PW) & (ww < wj * _SW - _PW + _KW)).astype(np.float32)  # (W, Wo)
    # P[h*W + w, i*Wo + j] = L[i, h] * R[w, j] / 16   (count_include_pad=True)
    P = np.kron(L.T, R) / float(_KH * _KW)                     # (H*W, Ho*Wo)
    return np.kron(np.eye(_G, dtype=np.float32), P)            # (G*H*W, G*Ho*Wo)


def _pick_block_rows(num_rows, row_bytes, target_bytes=6 << 20, small_bytes=4 << 20):
    """Rows (of G packed planes) per grid step.

    Multiple of 8; ~6 MiB of input per block; a single block for tiny problems;
    an even block count when split (v7x shards the parallel axis over 2 TCs)."""
    rows8 = _ceil_to(num_rows, 8)
    if num_rows * row_bytes <= small_bytes:
        return int(rows8)                                   # one block, one grid step
    tb = max(8, (target_bytes // row_bytes) // 8 * 8)
    tb = min(tb, rows8)
    nb = -(-num_rows // tb)
    if nb > 1 and nb % 2:                                   # prefer even #blocks (v7x)
        tb_even = _ceil_to(-(-num_rows // (nb + 1)), 8)
        if tb_even > 0 and (-(-num_rows // tb_even)) % 2 == 0:
            tb = tb_even
    return int(tb)


@jax.jit
def avg_pool_relu(x):
    """x: (N, C, D, H, W) float32 -> (N, C, D, Ho, Wo) float32."""
    N, C, D, H, W = x.shape
    Ho = (H + 2 * _PH - _KH) // _SH + 1
    Wo = (W + 2 * _PW - _KW) // _SW + 1
    B = N * C * D
    HW, OW = H * W, Ho * Wo

    xb = x.reshape(B, HW)
    Bp = _ceil_to(B, _G)
    if Bp != B:
        # Rare edge case: pad with zero planes so B groups evenly into rows of G.
        xb = jnp.pad(xb, ((0, Bp - B), (0, 0)))
    rows = Bp // _G
    xg = xb.reshape(rows, _G * HW)                          # free view, lane-dense rows

    # Constant pooling matrix, bf16 (exact), baked into the jitted program.
    p_blk = jnp.asarray(_pooling_matrix_np(H, W, Ho, Wo), dtype=jnp.bfloat16)

    row_bytes = _G * HW * x.dtype.itemsize
    TB = _pick_block_rows(rows, row_bytes)
    num_blocks = pl.cdiv(rows, TB)

    # Explicit VMEM budget: 2x in + 2x out (double buffered) + 2x P + in-kernel
    # bf16 temporaries + slack.  Stays well under v7x's 64 MiB physical VMEM and
    # raises v5e's 16 MiB scoped default.
    in_blk = TB * _G * HW * 4
    out_blk = TB * _G * OW * 4
    p_bytes = int(p_blk.size) * 2
    vmem_limit = int(max(3 * in_blk + 2 * out_blk + 2 * p_bytes + (4 << 20), 32 << 20))

    out = pl.pallas_call(
        _pool_relu_kernel,
        out_shape=jax.ShapeDtypeStruct((rows, _G * OW), x.dtype),
        grid=(num_blocks,),
        in_specs=[
            pl.BlockSpec((TB, _G * HW), lambda b: (b, 0)),
            pl.BlockSpec((_G * HW, _G * OW), lambda b: (0, 0)),   # constant, resident
        ],
        out_specs=pl.BlockSpec((TB, _G * OW), lambda b: (b, 0)),
        compiler_params=pltpu.CompilerParams(
            dimension_semantics=("parallel",),
            vmem_limit_bytes=vmem_limit,
        ),
    )(xg, p_blk)

    return out.reshape(Bp, OW)[:B].reshape(N, C, D, Ho, Wo)


def _reference(x):
    """Pure-JAX reference of AvgPool3d((1,4,4), pad (0,1,1), stride (1,4,4)) + ReLU."""
    N, C, D, H, W = x.shape
    Ho = (H + 2 - 4) // 4 + 1
    Wo = (W + 2 - 4) // 4 + 1
    xp = jnp.pad(x, ((0, 0), (0, 0), (0, 0), (1, 1), (1, 1)))
    xp = xp[..., : Ho * 4, : Wo * 4]
    xw = xp.reshape(N, C, D, Ho, 4, Wo, 4)
    pooled = xw.sum(axis=(4, 6)) / 16.0
    return jnp.maximum(pooled, 0.0)


if __name__ == "__main__":
    key = jax.random.PRNGKey(0)

    # Small 5-D input consistent with AvgPool3d: (N, C, D, H, W)
    x = jax.random.normal(key, (2, 4, 3, 16, 16), dtype=jnp.float32)
    out = jax.block_until_ready(avg_pool_relu(x))
    ref = _reference(x)
    np.testing.assert_allclose(np.asarray(out), np.asarray(ref), rtol=1e-4, atol=2e-5)

    # Edge case: plane count not a multiple of 8 (exercises the pad/slice path).
    x2 = jax.random.normal(jax.random.PRNGKey(1), (1, 2, 3, 16, 16), dtype=jnp.float32)
    out2 = jax.block_until_ready(avg_pool_relu(x2))
    ref2 = _reference(x2)
    np.testing.assert_allclose(np.asarray(out2), np.asarray(ref2), rtol=1e-4, atol=2e-5)

    print("KERNEL_OK")
</pallas_src>

<mosaic_0001>
module attributes {stable_mosaic.version = 11 : i64} {
  func.func @_pool_relu_kernel(%arg0: i32, %arg1: memref<8x2048xf32, #tpu.memory_space<vmem>>, %arg2: memref<2048x128xbf16, #tpu.memory_space<vmem>>, %arg3: memref<8x128xf32, #tpu.memory_space<vmem>>) attributes {dimension_semantics = [#tpu.dimension_semantics<parallel>], iteration_bounds = array<i64: 1>, scalar_prefetch = 0 : i64, scratch_operands = 0 : i64, tpu.core_type = #tpu.core_type<tc>, window_params = [{transform_indices = @transform_0, window_bounds = array<i64: 8, 2048>}, {pipeline_mode = #tpu.pipeline_mode<synchronous>, transform_indices = @transform_1, window_bounds = array<i64: 2048, 128>}, {transform_indices = @transform_2, window_bounds = array<i64: 8, 128>}]} {
    %c0 = arith.constant 0 : index
    %c0_0 = arith.constant 0 : index
    %0 = vector.load %arg1[%c0, %c0_0] : memref<8x2048xf32, #tpu.memory_space<vmem>>, vector<8x2048xf32>
    %c0_1 = arith.constant 0 : index
    %c0_2 = arith.constant 0 : index
    %1 = vector.load %arg2[%c0_1, %c0_2] : memref<2048x128xbf16, #tpu.memory_space<vmem>>, vector<2048x128xbf16>
    %2 = arith.truncf %0 : vector<8x2048xf32> to vector<8x2048xbf16>
    %3 = arith.extf %2 : vector<8x2048xbf16> to vector<8x2048xf32>
    %4 = arith.subf %0, %3 : vector<8x2048xf32>
    %5 = arith.truncf %4 : vector<8x2048xf32> to vector<8x2048xbf16>
    %cst = arith.constant dense<0.000000e+00> : vector<8x128xf32>
    %6 = tpu.matmul %2, %1, %cst {dimension_numbers = #tpu.dot_dimension_numbers<[1], [0], [0], [1], [0, 0, 1, 1], [], []>} : vector<8x2048xbf16>, vector<2048x128xbf16>, vector<8x128xf32> -> vector<8x128xf32>
    %cst_3 = arith.constant dense<0.000000e+00> : vector<8x128xf32>
    %7 = tpu.matmul %5, %1, %cst_3 {dimension_numbers = #tpu.dot_dimension_numbers<[1], [0], [0], [1], [0, 0, 1, 1], [], []>} : vector<8x2048xbf16>, vector<2048x128xbf16>, vector<8x128xf32> -> vector<8x128xf32>
    %8 = arith.addf %6, %7 : vector<8x128xf32>
    %cst_4 = arith.constant 0.000000e+00 : f32
    %9 = vector.broadcast %cst_4 : f32 to vector<8x128xf32>
    %10 = arith.maximumf %8, %9 : vector<8x128xf32>
    %c0_5 = arith.constant 0 : index
    %c0_6 = arith.constant 0 : index
    %11 = vector.load %arg3[%c0_5, %c0_6] : memref<8x128xf32, #tpu.memory_space<vmem>>, vector<8x128xf32>
    tpu.vector_store %arg3[%c0_5, %c0_6], %10 {strides = array<i32>} : memref<8x128xf32, #tpu.memory_space<vmem>>, vector<8x128xf32>,
    return
  }
  func.func @transform_0(%arg0: i32) -> (i32, i32) {
    %c0_i32 = arith.constant 0 : i32
    %c0_i32_0 = arith.constant 0 : i32
    return %arg0, %c0_i32 : i32, i32
  }
  func.func @transform_1(%arg0: i32) -> (i32, i32) {
    %c0_i32 = arith.constant 0 : i32
    %c0_i32_0 = arith.constant 0 : i32
    %c0_i32_1 = arith.constant 0 : i32
    return %c0_i32, %c0_i32_0 : i32, i32
  }
  func.func @transform_2(%arg0: i32) -> (i32, i32) {
    %c0_i32 = arith.constant 0 : i32
    %c0_i32_0 = arith.constant 0 : i32
    return %arg0, %c0_i32 : i32, i32
  }
}

</mosaic_0001>

<bundles_post_ra>
// kernel: avg_pool_relu.1
= control target key start
LH: loop header
LB: loop body
LE: loop exit
PB: predicated region body
PF: predicated region fallthrough
CT: control target
= control target key end

     0   :  { %7 = vsyncpa [#allocation3], 0  ;;  %s2515_s12 = smov [#allocation2]   ;;  %s2516_s14 = smov 64   ;;  %s3227_s0 = inlined_call_operand.vmem [shape: f32[3,2048], index: 0, kind: input, shape index: {}]   ;;  %s3228_s1 = inlined_call_operand.hbm [shape: bf16[2048,128], index: 1, kind: input, shape index: {}]   ;;  %s3229_s2 = inlined_call_operand.vmem [shape: f32[3,128], index: 2, kind: output, shape index: {}]  }
   0x1   :  { %s14_s11 = sshll.u32 %s3228_s1, 4  ;;  %s16_s13 = sshll.u32 %s2515_s12, 4  ;;  %s15_s11 = int_to_ptr.hbm [resolvable:$true] %s14_s11  ;;  %s17_s13 = int_to_ptr.vmem [resolvable:$true] %s16_s13 }
   0x2   :  { %s2517_s15 = smov 4  }
   0x3   :  { %22 = dma.hbm_to_vmem [thread:$0]  %s15_s11, 16384, %s17_s13, [#allocation3], %s2516_s14, %s2516_s14, %s2517_s15  }
   0x4   :  { %2513 = dma.done.wait [#allocation3], 16384  }
   0x5   :  { %2514 = vsyncadd [#allocation3], 4294950912  ;;  %v2536_v0 = vld [vmem:[#allocation2 + $0x38] sm:$0xff]  ;;  %v2546_v4 = vld [vmem:[#allocation2 + $0x30] sm:$0xff]  ;;  %vm418_vm0 = vcmask 1043456  }
   0x6   :  { %v2538_v1 = vld [vmem:[#allocation2 + $0x78] sm:$0xff]  ;;  %1330 = vmatpush.bf16.msra.mxu0 %v2536_v0  ;;  %v2548_v5 = vld [vmem:[#allocation2 + $0x70] sm:$0xff]  ;;  %v2558_v8 = vld [vmem:[#allocation2 + $0x28] sm:$0xff] }
   0x7   :  { %v2540_v2 = vld [vmem:[#allocation2 + $0xb8] sm:$0xff]  ;;  %1343 = vmatpush.bf16.msra.mxu1 %v2538_v1  ;;  %v2552_v6 = vld [vmem:[#allocation2 + $0xb0] sm:$0xff]  ;;  %v2560_v9 = vld [vmem:[#allocation2 + $0x68] sm:$0xff] }
   0x8   :  { %v2542_v3 = vld [vmem:[#allocation2 + $0xf8] sm:$0xff]  ;;  %1356 = vmatpush.bf16.msra.mxu2 %v2540_v2  ;;  %v2554_v7 = vld [vmem:[#allocation2 + $0xf0] sm:$0xff]  ;;  %v2564_v10 = vld [vmem:[#allocation2 + $0xa8] sm:$0xff] }
   0x9   :  { %1369 = vmatpush.bf16.msra.mxu3 %v2542_v3  ;;  %v2566_v11 = vld [vmem:[#allocation2 + $0xe8] sm:$0xff]  ;;  %v2570_v12 = vld [vmem:[#allocation2 + $0x20] sm:$0xff]  ;;  %v2582_v16 = vld [vmem:[#allocation2 + $0x18] sm:$0xff] }
   0xa   :  { %1331 = vmatpush.bf16.msra.mxu0 %v2546_v4  ;;  %v2572_v13 = vld [vmem:[#allocation2 + $0x60] sm:$0xff]  ;;  %v2584_v17 = vld [vmem:[#allocation2 + $0x58] sm:$0xff]  ;;  %v2599_v21 = vld [vmem:[#allocation2 + $0x10] sm:$0xff] }
   0xb   :  { %1344 = vmatpush.bf16.msra.mxu1 %v2548_v5  ;;  %v2576_v14 = vld [vmem:[#allocation2 + $0xa0] sm:$0xff]  ;;  %v2588_v18 = vld [vmem:[#allocation2 + $0x98] sm:$0xff]  ;;  %v2601_v22 = vld [vmem:[#allocation2 + $0x50] sm:$0xff] }
   0xc   :  { %1357 = vmatpush.bf16.msra.mxu2 %v2552_v6  ;;  %v2578_v15 = vld [vmem:[#allocation2 + $0xe0] sm:$0xff]  ;;  %v2590_v19 = vld [vmem:[#allocation2 + $0xd8] sm:$0xff]  ;;  %v2611_v24 = vld [vmem:[#allocation2 + $0x90] sm:$0xff] }
   0xd   :  { %1370 = vmatpush.bf16.msra.mxu3 %v2554_v7  ;;  %v2595_v20 = vld [vmem:[%s3227_s0 + $0x8] sm:$0xff]  ;;  %v2613_v25 = vld [vmem:[#allocation2 + $0xd0] sm:$0xff]  ;;  %v2619_v26 = vld [vmem:[%s3227_s0] sm:$0xff] }
   0xe   :  { %1332 = vmatpush.bf16.msra.mxu0 %v2558_v8  ;;  %v2606_v23 = vld [vmem:[%s3227_s0 + $0x48] sm:$0xff]  ;;  %319 = vst [vmem:[#allocation1 + $0x10] ss:$2 sm:$0xff] %v2595_v20  ;;  %v2624_v27 = vld [vmem:[%s3227_s0 + $0x40] sm:$0xff]  ;;  %v2630_v28 = vld [vmem:[%s3227_s0 + $0x18] sm:$0xff] }
   0xf   :  { %1345 = vmatpush.bf16.msra.mxu1 %v2560_v9  ;;  %321 = vst [vmem:[#allocation1 + $0x11] ss:$2 sm:$0xff] %v2606_v23  ;;  %v2634_v29 = vld [vmem:[#allocation2 + $0x8] sm:$0xff]  ;;  %v2642_v31 = vld [vmem:[%s3227_s0 + $0x58] sm:$0xff]  ;;  %v2651_v34 = vld [vmem:[#allocation2] sm:$0xff] }
  0x10   :  { %1358 = vmatpush.bf16.msra.mxu2 %v2564_v10  ;;  %315 = vst [vmem:[#allocation1] ss:$2 sm:$0xff] %v2619_v26  ;;  %v2636_v30 = vld [vmem:[#allocation2 + $0x48] sm:$0xff]  ;;  %v2653_v35 = vld [vmem:[#allocation2 + $0x40] sm:$0xff]  ;;  %v2680_v43 = vld [vmem:[#allocation2 + $0x138] sm:$0xff] }
  0x11   :  { %1371 = vmatpush.bf16.msra.mxu3 %v2566_v11  ;;  %317 = vst [vmem:[#allocation1 + $0x1] ss:$2 sm:$0xff] %v2624_v27  ;;  %v2646_v32 = vld [vmem:[#allocation2 + $0x88] sm:$0xff]  ;;  %v2658_v36 = vld [vmem:[%s3227_s0 + $0x28] sm:$0xff]  ;;  %v2682_v44 = vld [vmem:[#allocation2 + $0x178] sm:$0xff] }
  0x12   :  { %1333 = vmatpush.bf16.msra.mxu0 %v2570_v12  ;;  %v2648_v33 = vld [vmem:[#allocation2 + $0xc8] sm:$0xff]  ;;  %327 = vst [vmem:[#allocation1 + $0x30] ss:$2 sm:$0xff] %v2630_v28  ;;  %v2666_v38 = vld [vmem:[#allocation2 + $0x80] sm:$0xff]  ;;  %v2690_v46 = vld [vmem:[%s3227_s0 + $0x20] sm:$0xff] }
  0x13   :  { %1346 = vmatpush.bf16.msra.mxu1 %v2572_v13  ;;  %3316 = vst [vmem:[#allocation6_spill] sm:$0xff] %v2651_v34  ;;  %v2664_v37 = vld [vmem:[%s3227_s0 + $0x10] sm:$0xff]  ;;  %v2668_v39 = vld [vmem:[#allocation2 + $0xc0] sm:$0xff]  ;;  %v2692_v47 = vld [vmem:[#allocation2 + $0x1b8] sm:$0xff] }
  0x14   :  { %1359 = vmatpush.bf16.msra.mxu2 %v2576_v14  ;;  %3317 = vst [vmem:[#allocation7_spill] sm:$0xff] %v2653_v35  ;;  %v2673_v40 = vld [vmem:[%s3227_s0 + $0x68] sm:$0xff]  ;;  %v2694_v48 = vld [vmem:[#allocation2 + $0x1f8] sm:$0xff]  ;;  %v2712_v55 = vld [vmem:[%s3227_s0 + $0x38] sm:$0xff] }
  0x15   :  { %1372 = vmatpush.bf16.msra.mxu3 %v2578_v15  ;;  %329 = vst [vmem:[#allocation1 + $0x31] ss:$2 sm:$0xff] %v2642_v31  ;;  %v2700_v49 = vld [vmem:[%s3227_s0 + $0x60] sm:$0xff]  ;;  %v2716_v56 = vld [vmem:[#allocation2 + $0x130] sm:$0xff] }
  0x16   :  { %1334 = vmatpush.bf16.msra.mxu0 %v2582_v16  ;;  %3318 = vst [vmem:[#allocation8_spill] sm:$0xff] %v2666_v38  ;;  %v332_v41 = vld.sshfl [vmem:[#allocation1 + $0x10] sm:$0xff pattern:$0x75316420]  ;;  %v2718_v57 = vld [vmem:[#allocation2 + $0x170] sm:$0xff] }
  0x17   :  { %1347 = vmatpush.bf16.msra.mxu1 %v2584_v17  ;;  %3319 = vst [vmem:[#allocation9_spill] sm:$0xff] %v2668_v39  ;;  %v333_v42 = vld.sshfl [vmem:[#allocation1 + $0x18] sm:$0xff pattern:$0x75316420] }
  0x18   :  { %1360 = vmatpush.bf16.msra.mxu2 %v2588_v18  ;;  %323 = vst [vmem:[#allocation1 + $0x20] ss:$2 sm:$0xff] %v2664_v37  ;;  %v2685_v45 = vpack.c.bf16 %v333_v42, %v332_v41  ;;  %v330_v52 = vld.sshfl [vmem:[#allocation1] sm:$0xff pattern:$0x75316420]  ;;  %v2724_v59 = vld [vmem:[%s3227_s0 + $0x78] sm:$0xff] }
  0x19   :  { %1373 = vmatpush.bf16.msra.mxu3 %v2590_v19  ;;  %3320 = vst [vmem:[#allocation10_spill] sm:$0xff] %v2680_v43  ;;  %v331_v53 = vld.sshfl [vmem:[#allocation1 + $0x8] sm:$0xff pattern:$0x75316420]  ;;  %v2732_v41 = vld [vmem:[#allocation2 + $0x1b0] sm:$0xff] }
  0x1a   :  { %1335 = vmatpush.bf16.msra.mxu0 %v2599_v21  ;;  %3321 = vst [vmem:[#allocation11_spill] sm:$0xff] %v2682_v44  ;;  %v380_v50 = vunpack.c.l.bf16 %v2685_v45  ;;  %v381_v51 = vunpack.c.h.bf16 %v2685_v45  ;;  %v2707_v54 = vpack.c.bf16 %v331_v53, %v330_v52  ;;  %v2734_v42 = vld [vmem:[#allocation2 + $0x1f0] sm:$0xff] }
  0x1b   :  { %1348 = vmatpush.bf16.msra.mxu1 %v2601_v22  ;;  %340 = vst [vmem:[#allocation1 + $0x10] ss:$2 sm:$0xff] %v2658_v36 }
  0x1c   :  { %1361 = vmatpush.bf16.msra.mxu2 %v2611_v24  ;;  %3322 = vst [vmem:[#allocation12_spill] sm:$0xff] %v2692_v47  ;;  %v411_v58 = vrot.slane %v381_v51, 4  ;;  %v378_v60 = vunpack.c.l.bf16 %v2707_v54  ;;  %v379_v61 = vunpack.c.h.bf16 %v2707_v54  ;;  %v336_v62 = vld.sshfl [vmem:[#allocation1 + $0x30] sm:$0xff pattern:$0x75316420] }
  0x1d   :  { %1374 = vmatpush.bf16.msra.mxu3 %v2613_v25  ;;  %3323 = vst [vmem:[#allocation13_spill] sm:$0xff] %v2694_v48  ;;  %v337_v63 = vld.sshfl [vmem:[#allocation1 + $0x38] sm:$0xff pattern:$0x75316420] }
  0x1e   :  { %1336 = vmatpush.bf16.msra.mxu0 %v2634_v29  ;;  %341 = vst [vmem:[#allocation1 + $0x11] ss:$2 sm:$0xff] %v2673_v40  ;;  %v420_v51 = vsel %vm418_vm0, %v380_v50, %v411_v58  ;;  %v429_v52 = vsel %vm418_vm0, %v411_v58, %v380_v50  ;;  %v2739_v53 = vpack.c.bf16 %v337_v63, %v336_v62  ;;  %v2752_v58 = vld [vmem:[#allocation2 + $0x128] sm:$0xff] }
  0x1f   :  { %1349 = vmatpush.bf16.msra.mxu1 %v2636_v30  ;;  %338 = vst [vmem:[#allocation1] ss:$2 sm:$0xff] %v2690_v46 }
  0x20   :  { %1362 = vmatpush.bf16.msra.mxu2 %v2646_v32  ;;  %3324 = vst [vmem:[#allocation14_spill] sm:$0xff] %v2716_v56  ;;  %v385_v50 = vunpack.c.h.bf16 %v2739_v53 }
  0x21   :  { %1375 = vmatpush.bf16.msra.mxu3 %v2648_v33  ;;  %3325 = vst [vmem:[#allocation15_spill] sm:$0xff] %v2718_v57 }
  0x22   :  { %1337 = vmatpush.bf16.msra.mxu0 %v2651_v34  ;;  %339 = vst [vmem:[#allocation1 + $0x1] ss:$2 sm:$0xff] %v2700_v49 }
  0x23   :  { %1350 = vmatpush.bf16.msra.mxu1 %v2653_v35  ;;  %3326 = vst [vmem:[#allocation16_spill] sm:$0xff] %v2732_v41  ;;  %v384_v35 = vunpack.c.l.bf16 %v2739_v53 }
  0x24   :  { %1363 = vmatpush.bf16.msra.mxu2 %v2666_v38  ;;  %3327 = vst [vmem:[#allocation17_spill] sm:$0xff] %v2734_v42 }
  0x25   :  { %1376 = vmatpush.bf16.msra.mxu3 %v2668_v39  ;;  %344 = vst [vmem:[#allocation1 + $0x30] ss:$2 sm:$0xff] %v2712_v55  ;;  %v410_v39 = vrot.slane %v379_v61, 4  ;;  %v349_v38 = vld.sshfl [vmem:[#allocation1 + $0x18] sm:$0xff pattern:$0x75316420] }
  0x26   :  { %1382 = vmatpush.bf16.msrb.mxu0 %v2680_v43  ;;  %3328 = vst [vmem:[#allocation18_spill] sm:$0xff] %v2739_v53  ;;  %v460_v43 = vsub.f32 %v2595_v20, %v420_v51  ;;  %v2754_v20 = vld [vmem:[#allocation2 + $0x168] sm:$0xff] }
  0x27   :  { %1395 = vmatpush.bf16.msrb.mxu1 %v2682_v44  ;;  %v430_v44 = vrot.slane %v429_v52, 4  ;;  %345 = vst [vmem:[#allocation1 + $0x31] ss:$2 sm:$0xff] %v2724_v59  ;;  %v419_v63 = vsel %vm418_vm0, %v378_v60, %v410_v39  ;;  %v2762_v51 = vld [vmem:[#allocation2 + $0x1a8] sm:$0xff]  ;;  %v427_v53 = vsel %vm418_vm0, %v410_v39, %v378_v60  ;;  %v2781_v60 = vld [vmem:[#allocation2 + $0x1e0] sm:$0xff] }
  0x28   :  { %1408 = vmatpush.bf16.msrb.mxu2 %v2692_v47  ;;  %v348_v47 = vld.sshfl [vmem:[#allocation1 + $0x10] sm:$0xff pattern:$0x75316420]  ;;  %3329 = vst [vmem:[#allocation19_spill] sm:$0xff] %v2752_v58 }
  0x29   :  { %1421 = vmatpush.bf16.msrb.mxu3 %v2694_v48  ;;  %v2746_v48 = vld [vmem:[%s3227_s0 + $0x50] sm:$0xff]  ;;  %3330 = vst [vmem:[#allocation20_spill] sm:$0xff] %v2754_v20  ;;  %v2756_v61 = vpack.c.bf16 %v349_v38, %v348_v47  ;;  %v468_v62 = vsub.f32 %v2606_v23, %v430_v44  ;;  %v428_v44 = vrot.slane %v427_v53, 4  ;;  %v2771_v47 = vld [vmem:[#allocation2 + $0x120] sm:$0xff] }
  0x2a   :  { %1383 = vmatpush.bf16.msrb.mxu0 %v2716_v56  ;;  %495 = vst [vmem:[#allocation1 + $0x10] ss:$2 sm:$0xff] %v460_v43  ;;  %v2764_v52 = vld [vmem:[#allocation2 + $0x1e8] sm:$0xff]  ;;  %v413_v56 = vrot.slane %v385_v50, 4 }
  0x2b   :  { %1396 = vmatpush.bf16.msrb.mxu1 %v2718_v57  ;;  %3331 = vst [vmem:[#allocation21_spill] sm:$0xff] %v2756_v61  ;;  %v459_v57 = vsub.f32 %v2619_v26, %v419_v63  ;;  %v388_v23 = vunpack.c.l.bf16 %v2756_v61  ;;  %v389_v38 = vunpack.c.h.bf16 %v2756_v61  ;;  %v346_v43 = vld.sshfl [vmem:[#allocation1] sm:$0xff pattern:$0x75316420]  ;;  %v2779_v26 = vld [vmem:[#allocation2 + $0x1a0] sm:$0xff]  ;;  %v467_v53 = vsub.f32 %v2624_v27, %v428_v44 }
  0x2c   :  { %1409 = vmatpush.bf16.msrb.mxu2 %v2732_v41  ;;  %325 = vst [vmem:[#allocation1 + $0x21] ss:$2 sm:$0xff] %v2746_v48  ;;  %v347_v41 = vld.sshfl [vmem:[#allocation1 + $0x8] sm:$0xff pattern:$0x75316420]  ;;  %v422_v34 = vsel %vm418_vm0, %v384_v35, %v413_v56  ;;  %v433_v39 = vsel %vm418_vm0, %v413_v56, %v384_v35  ;;  %v2793_v27 = vld [vmem:[#allocation2 + $0x118] sm:$0xff] }
  0x2d   :  { %1422 = vmatpush.bf16.msrb.mxu3 %v2734_v42  ;;  %497 = vst [vmem:[#allocation1 + $0x11] ss:$2 sm:$0xff] %v468_v62  ;;  %v2773_v42 = vld [vmem:[#allocation2 + $0x160] sm:$0xff]  ;;  %v415_v50 = vrot.slane %v389_v38, 4  ;;  %v2783_v62 = vpack.c.bf16 %v347_v41, %v346_v43  ;;  %v434_v63 = vrot.slane %v433_v39, 4  ;;  %v462_v61 = vsub.f32 %v2630_v28, %v422_v34  ;;  %v2802_v28 = vld [vmem:[#allocation2 + $0x198] sm:$0xff] }
  0x2e   :  { %3332 = vst [vmem:[#allocation22_spill] sm:$0xff] %v2771_v47  ;;  %1384 = vmatpush.bf16.msrb.mxu0 %v2752_v58  ;;  %v352_v35 = vld.sshfl [vmem:[#allocation1 + $0x30] sm:$0xff pattern:$0x75316420]  ;;  %v2804_v34 = vld [vmem:[#allocation2 + $0x1d8] sm:$0xff] }
  0x2f   :  { %3333 = vst [vmem:[#allocation23_spill] sm:$0xff] %v2773_v42  ;;  %1397 = vmatpush.bf16.msrb.mxu1 %v2754_v20  ;;  %v353_v56 = vld.sshfl [vmem:[#allocation1 + $0x38] sm:$0xff pattern:$0x75316420]  ;;  %v424_v20 = vsel %vm418_vm0, %v388_v23, %v415_v50  ;;  %v437_v58 = vsel %vm418_vm0, %v415_v50, %v388_v23  ;;  %v386_v38 = vunpack.c.l.bf16 %v2783_v62  ;;  %v387_v41 = vunpack.c.h.bf16 %v2783_v62 }
  0x30   :  { %3334 = vst [vmem:[#allocation24_spill] sm:$0xff] %v2779_v26  ;;  %1410 = vmatpush.bf16.msrb.mxu2 %v2762_v51  ;;  %v438_v43 = vrot.slane %v437_v58, 4  ;;  %v464_v44 = vsub.f32 %v2658_v36, %v424_v20  ;;  %v2798_v39 = vpack.c.bf16 %v353_v56, %v352_v35  ;;  %v470_v50 = vsub.f32 %v2642_v31, %v434_v63 }
  0x31   :  { %3335 = vst [vmem:[#allocation25_spill] sm:$0xff] %v2781_v60  ;;  %1423 = vmatpush.bf16.msrb.mxu3 %v2764_v52  ;;  %v414_v23 = vrot.slane %v387_v41, 4 }
  0x32   :  { %3336 = vst [vmem:[#allocation26_spill] sm:$0xff] %v2783_v62  ;;  %1385 = vmatpush.bf16.msrb.mxu0 %v2771_v47  ;;  %v472_v36 = vsub.f32 %v2673_v40, %v438_v43  ;;  %v393_v35 = vunpack.c.h.bf16 %v2798_v39 }
  0x33   :  { %491 = vst [vmem:[#allocation1] ss:$2 sm:$0xff] %v459_v57  ;;  %v2795_v57 = vld [vmem:[#allocation2 + $0x158] sm:$0xff]  ;;  %1398 = vmatpush.bf16.msrb.mxu1 %v2773_v42  ;;  %v423_v62 = vsel %vm418_vm0, %v386_v38, %v414_v23  ;;  %v435_v41 = vsel %vm418_vm0, %v414_v23, %v386_v38  ;;  %v335_v63 = vld.sshfl [vmem:[#allocation1 + $0x28] sm:$0xff pattern:$0x75316420] }
  0x34   :  { %493 = vst [vmem:[#allocation1 + $0x1] ss:$2 sm:$0xff] %v467_v53  ;;  %v334_v53 = vld.sshfl [vmem:[#allocation1 + $0x20] sm:$0xff pattern:$0x75316420]  ;;  %1411 = vmatpush.bf16.msrb.mxu2 %v2779_v26  ;;  %v2814_v42 = vld [vmem:[#allocation2 + $0x110] sm:$0xff]  ;;  %v463_v40 = vsub.f32 %v2690_v46, %v423_v62 }
  0x35   :  { %3337 = vst [vmem:[#allocation27_spill] sm:$0xff] %v2798_v39  ;;  %1424 = vmatpush.bf16.msrb.mxu3 %v2781_v60  ;;  %v508_v58 = vld.sshfl [vmem:[#allocation1 + $0x10] sm:$0xff pattern:$0x75316420]  ;;  %v2816_v26 = vld [vmem:[#allocation2 + $0x150] sm:$0xff]  ;;  %v436_v60 = vrot.slane %v435_v41, 4  ;;  %v2819_v47 = vpack.c.bf16 %v335_v63, %v334_v53 }
  0x36   :  { %503 = vst [vmem:[#allocation1 + $0x30] ss:$2 sm:$0xff] %v462_v61  ;;  %v509_v20 = vld.sshfl [vmem:[#allocation1 + $0x18] sm:$0xff pattern:$0x75316420]  ;;  %v392_v61 = vunpack.c.l.bf16 %v2798_v39  ;;  %v548_v56 = vpack.c.bf16 %v508_v58, %v508_v58  ;;  %v417_v43 = vrot.slane %v393_v35, 4  ;;  %1386 = vmatpush.bf16.msrb.mxu0 %v2793_v27 }
  0x37   :  { %516 = vst [vmem:[#allocation1 + $0x10] ss:$2 sm:$0xff] %v464_v44  ;;  %v549_v31 = vpack.c.bf16 %v509_v20, %v509_v20  ;;  %1399 = vmatpush.bf16.msrb.mxu1 %v2795_v57  ;;  %v2823_v58 = vld [vmem:[#allocation2 + $0x190] sm:$0xff]  ;;  %v2830_v44 = vld [vmem:[%s3227_s0 + $0x30] sm:$0xff]  ;;  %v471_v46 = vsub.f32 %v2700_v49, %v436_v60  ;;  %v382_v20 = vunpack.c.l.bf16 %v2819_v47  ;;  %v383_v49 = vunpack.c.h.bf16 %v2819_v47 }
  0x38   :  { %517 = vst [vmem:[#allocation1 + $0x11] ss:$2 sm:$0xff] %v472_v36  ;;  %v2825_v38 = vld [vmem:[#allocation2 + $0x1d0] sm:$0xff]  ;;  %1412 = vmatpush.bf16.msrb.mxu2 %v2802_v28  ;;  %v426_v53 = vsel %vm418_vm0, %v392_v61, %v417_v43  ;;  %v441_v36 = vsel %vm418_vm0, %v417_v43, %v392_v61  ;;  %v2841_v63 = vld [vmem:[%s3227_s0 + $0x70] sm:$0xff] }
  0x39   :  { %3338 = vst [vmem:[#allocation28_spill] sm:$0xff] %v2819_v47  ;;  %1425 = vmatpush.bf16.msrb.mxu3 %v2804_v34  ;;  %1364 = vmatmul.bf16.vlgmr.msra.gmra.mxu2 %v548_v56  ;;  %v442_v41 = vrot.slane %v441_v36, 4  ;;  %v2846_v60 = vld [vmem:[#allocation2 + $0x108] sm:$0xff]  ;;  %v412_v56 = vrot.slane %v383_v49, 4  ;;  %v466_v43 = vsub.f32 %v2712_v55, %v426_v53  ;;  %v2862_v36 = vld [vmem:[#allocation2 + $0x100] sm:$0xff]  ;;  %v2882_v47 = vld [vmem:[#allocation2 + $0x2f8] sm:$0xff] }
  0x3a   :  { %505 = vst [vmem:[#allocation1 + $0x31] ss:$2 sm:$0xff] %v470_v50  ;;  %1377 = vmatmul.bf16.vlgmr.msra.gmra.mxu3 %v549_v31  ;;  %1387 = vmatpush.bf16.msrb.mxu0 %v2814_v42  ;;  %v2848_v61 = vld [vmem:[#allocation2 + $0x148] sm:$0xff]  ;;  %v2864_v49 = vld [vmem:[#allocation2 + $0x140] sm:$0xff] }
  0x3b   :  { %v506_v62 = vld.sshfl [vmem:[#allocation1] sm:$0xff pattern:$0x75316420]  ;;  %v507_v23 = vld.sshfl [vmem:[#allocation1 + $0x8] sm:$0xff pattern:$0x75316420]  ;;  %1400 = vmatpush.bf16.msrb.mxu1 %v2816_v26 }
  0x3c   :  { %v546_v50 = vpack.c.bf16 %v506_v62, %v506_v62  ;;  %514 = vst [vmem:[#allocation1] ss:$2 sm:$0xff] %v463_v40  ;;  %v547_v35 = vpack.c.bf16 %v507_v23, %v507_v23  ;;  %1413 = vmatpush.bf16.msrb.mxu2 %v2823_v58  ;;  %v2853_v31 = vld [vmem:[#allocation2 + $0x188] sm:$0xff]  ;;  %v421_v62 = vsel %vm418_vm0, %v382_v20, %v412_v56 }
  0x3d   :  { %515 = vst [vmem:[#allocation1 + $0x1] ss:$2 sm:$0xff] %v471_v46  ;;  %1426 = vmatpush.bf16.msrb.mxu3 %v2825_v38  ;;  %v2855_v40 = vld [vmem:[#allocation2 + $0x1c8] sm:$0xff]  ;;  %v474_v46 = vsub.f32 %v2724_v59, %v442_v41  ;;  %v431_v23 = vsel %vm418_vm0, %v412_v56, %v382_v20  ;;  %v2870_v59 = vld [vmem:[#allocation2 + $0x180] sm:$0xff]  ;;  %v461_v20 = vsub.f32 %v2664_v37, %v421_v62  ;;  %v2877_v41 = vld [vmem:[#allocation2 + $0x278] sm:$0xff] }
  0x3e   :  { %342 = vst [vmem:[#allocation1 + $0x20] ss:$2 sm:$0xff] %v2830_v44  ;;  %1338 = vmatmul.bf16.vlgmr.msra.gmra.mxu0 %v546_v50  ;;  %1351 = vmatmul.bf16.vlgmr.msra.gmra.mxu1 %v547_v35  ;;  %v432_v39 = vrot.slane %v431_v23, 4  ;;  %v2872_v50 = vld [vmem:[#allocation2 + $0x1c0] sm:$0xff]  ;;  %v2875_v35 = vld [vmem:[#allocation2 + $0x238] sm:$0xff] }
  0x3f   :  { %3339 = vst [vmem:[#allocation29_spill] sm:$0xff] %v2853_v31  ;;  %1388 = vmatpush.bf16.msrb.mxu0 %v2846_v60  ;;  %1401 = vmatpush.bf16.msrb.mxu1 %v2848_v61  ;;  %v2880_v23 = vld [vmem:[#allocation2 + $0x2b8] sm:$0xff] }
  0x40   :  { %3340 = vst [vmem:[#allocation30_spill] sm:$0xff] %v2855_v40  ;;  %1414 = vmatpush.bf16.msrb.mxu2 %v2853_v31  ;;  %v469_v56 = vsub.f32 %v2746_v48, %v432_v39  ;;  %v2892_v48 = vld [vmem:[#allocation2 + $0x230] sm:$0xff] }
  0x41   :  { %343 = vst [vmem:[#allocation1 + $0x21] ss:$2 sm:$0xff] %v2841_v63  ;;  %v512_v55 = vld.sshfl [vmem:[#allocation1 + $0x30] sm:$0xff pattern:$0x75316420]  ;;  %1427 = vmatpush.bf16.msrb.mxu3 %v2855_v40  ;;  %v2894_v39 = vld [vmem:[#allocation2 + $0x270] sm:$0xff] }
  0x42   :  { %v513_v53 = vld.sshfl [vmem:[#allocation1 + $0x38] sm:$0xff pattern:$0x75316420]  ;;  %3341 = vst [vmem:[#allocation31_spill] sm:$0xff] %v2872_v50  ;;  %v552_v62 = vpack.c.bf16 %v512_v55, %v512_v55  ;;  %v2916_v55 = vld [vmem:[#allocation2 + $0x2e8] sm:$0xff] }
  0x43   :  { %520 = vst [vmem:[#allocation1 + $0x30] ss:$2 sm:$0xff] %v466_v43  ;;  %1389 = vmatpush.bf16.msrb.mxu0 %v2862_v36  ;;  %1402 = vmatpush.bf16.msrb.mxu1 %v2864_v49  ;;  %v2898_v43 = vld [vmem:[#allocation2 + $0x2b0] sm:$0xff] }
  0x44   :  { %3342 = vst [vmem:[#allocation32_spill] sm:$0xff] %v2875_v35  ;;  %1415 = vmatpush.bf16.msrb.mxu2 %v2870_v59 }
  0x45   :  { %3343 = vst [vmem:[#allocation33_spill] sm:$0xff] %v2877_v41  ;;  %1428 = vmatpush.bf16.msrb.mxu3 %v2872_v50 }
  0x46   :  { %521 = vst [vmem:[#allocation1 + $0x31] ss:$2 sm:$0xff] %v474_v46  ;;  %v2900_v46 = vld [vmem:[#allocation2 + $0x2f0] sm:$0xff] }
  0x47   :  { %3344 = vst [vmem:[#allocation34_spill] sm:$0xff] %v2880_v23  ;;  %1434 = vmatpush.bf16.msra.mxu0 %v2875_v35  ;;  %1447 = vmatpush.bf16.msra.mxu1 %v2877_v41 }
  0x48   :  { %3345 = vst [vmem:[#allocation35_spill] sm:$0xff] %v2882_v47  ;;  %v350_v40 = vld.sshfl [vmem:[#allocation1 + $0x20] sm:$0xff pattern:$0x75316420]  ;;  %1460 = vmatpush.bf16.msra.mxu2 %v2880_v23  ;;  %v2908_v23 = vld [vmem:[#allocation2 + $0x268] sm:$0xff] }
  0x49   :  { %v351_v31 = vld.sshfl [vmem:[#allocation1 + $0x28] sm:$0xff pattern:$0x75316420]  ;;  %3347 = vst [vmem:[#allocation37_spill] sm:$0xff] %v2892_v48  ;;  %1473 = vmatpush.bf16.msra.mxu3 %v2882_v47  ;;  %1416 = vmatmul.bf16.vlgmr.msrb.gmra.mxu2 %v552_v62  ;;  %v2952_v62 = vld [vmem:[#allocation2 + $0x290] sm:$0xff] }
  0x4a   :  { %v2888_v37 = vpack.c.bf16 %v351_v31, %v350_v40  ;;  %499 = vst [vmem:[#allocation1 + $0x20] ss:$2 sm:$0xff] %v461_v20  ;;  %v553_v20 = vpack.c.bf16 %v513_v53, %v513_v53 }
  0x4b   :  { %3348 = vst [vmem:[#allocation38_spill] sm:$0xff] %v2894_v39  ;;  %1435 = vmatpush.bf16.msra.mxu0 %v2892_v48  ;;  %1448 = vmatpush.bf16.msra.mxu1 %v2894_v39 }
  0x4c   :  { %3346 = vst [vmem:[#allocation36_spill] sm:$0xff] %v2888_v37  ;;  %v390_v31 = vunpack.c.l.bf16 %v2888_v37  ;;  %v391_v40 = vunpack.c.h.bf16 %v2888_v37  ;;  %1461 = vmatpush.bf16.msra.mxu2 %v2898_v43  ;;  %v2914_v37 = vld [vmem:[#allocation2 + $0x2a8] sm:$0xff]  ;;  %1429 = vmatmul.bf16.vlgmr.msrb.gmra.mxu3 %v553_v20  ;;  %v2954_v20 = vld [vmem:[#allocation2 + $0x2d0] sm:$0xff] }
  0x4d   :  { %501 = vst [vmem:[#allocation1 + $0x21] ss:$2 sm:$0xff] %v469_v56  ;;  %v2906_v56 = vld [vmem:[#allocation2 + $0x228] sm:$0xff]  ;;  %1474 = vmatpush.bf16.msra.mxu3 %v2900_v46 }
  0x4e   :  { %3349 = vst [vmem:[#allocation39_spill] sm:$0xff] %v2898_v43  ;;  %v416_v41 = vrot.slane %v391_v40, 4 }
  0x4f   :  { %3350 = vst [vmem:[#allocation40_spill] sm:$0xff] %v2900_v46  ;;  %1436 = vmatpush.bf16.msra.mxu0 %v2906_v56  ;;  %1449 = vmatpush.bf16.msra.mxu1 %v2908_v23  ;;  %v2924_v46 = vld [vmem:[#allocation2 + $0x260] sm:$0xff] }
  0x50   :  { %3351 = vst [vmem:[#allocation41_spill] sm:$0xff] %v2908_v23  ;;  %v425_v47 = vsel %vm418_vm0, %v390_v31, %v416_v41  ;;  %v439_v35 = vsel %vm418_vm0, %v416_v41, %v390_v31  ;;  %v2922_v31 = vld [vmem:[#allocation2 + $0x220] sm:$0xff]  ;;  %1462 = vmatpush.bf16.msra.mxu2 %v2914_v37  ;;  %v2996_v23 = vld [vmem:[#allocation2 + $0x370] sm:$0xff] }
  0x51   :  { %3352 = vst [vmem:[#allocation42_spill] sm:$0xff] %v2914_v37  ;;  %v440_v53 = vrot.slane %v439_v35, 4  ;;  %v465_v40 = vsub.f32 %v2830_v44, %v425_v47  ;;  %1475 = vmatpush.bf16.msra.mxu3 %v2916_v55  ;;  %v2928_v47 = vld [vmem:[#allocation2 + $0x2a0] sm:$0xff]  ;;  %v2936_v35 = vld [vmem:[#allocation2 + $0x258] sm:$0xff]  ;;  %v2994_v37 = vld [vmem:[#allocation2 + $0x330] sm:$0xff] }
  0x52   :  { %3353 = vst [vmem:[#allocation43_spill] sm:$0xff] %v2916_v55  ;;  %v2930_v44 = vld [vmem:[#allocation2 + $0x2e0] sm:$0xff]  ;;  %v2986_v55 = vld [vmem:[#allocation2 + $0x3f8] sm:$0xff] }
  0x53   :  { %v473_v50 = vsub.f32 %v2841_v63, %v440_v53  ;;  %3354 = vst [vmem:[#allocation44_spill] sm:$0xff] %v2922_v31  ;;  %1437 = vmatpush.bf16.msra.mxu0 %v2922_v31  ;;  %1450 = vmatpush.bf16.msra.mxu1 %v2924_v46  ;;  %v2934_v63 = vld [vmem:[#allocation2 + $0x218] sm:$0xff]  ;;  %v2958_v53 = vld [vmem:[#allocation2 + $0x208] sm:$0xff] }
  0x54   :  { %v510_v39 = vld.sshfl [vmem:[#allocation1 + $0x20] sm:$0xff pattern:$0x75316420]  ;;  %v511_v48 = vld.sshfl [vmem:[#allocation1 + $0x28] sm:$0xff pattern:$0x75316420]  ;;  %1463 = vmatpush.bf16.msra.mxu2 %v2928_v47 }
  0x55   :  { %v550_v43 = vpack.c.bf16 %v510_v39, %v510_v39  ;;  %518 = vst [vmem:[#allocation1 + $0x20] ss:$2 sm:$0xff] %v465_v40  ;;  %v551_v41 = vpack.c.bf16 %v511_v48, %v511_v48  ;;  %1476 = vmatpush.bf16.msra.mxu3 %v2930_v44  ;;  %v2940_v48 = vld [vmem:[#allocation2 + $0x298] sm:$0xff]  ;;  %v2960_v40 = vld [vmem:[#allocation2 + $0x248] sm:$0xff] }
  0x56   :  { %3355 = vst [vmem:[#allocation45_spill] sm:$0xff] %v2924_v46  ;;  %v2942_v39 = vld [vmem:[#allocation2 + $0x2d8] sm:$0xff]  ;;  %v525_v46 = vld.sshfl [vmem:[#allocation1 + $0x18] sm:$0xff pattern:$0x75316420] }
  0x57   :  { %3356 = vst [vmem:[#allocation46_spill] sm:$0xff] %v2928_v47  ;;  %1390 = vmatmul.bf16.vlgmr.msrb.gmra.mxu0 %v550_v43  ;;  %1403 = vmatmul.bf16.vlgmr.msrb.gmra.mxu1 %v551_v41  ;;  %v2948_v43 = vld [vmem:[#allocation2 + $0x250] sm:$0xff]  ;;  %v2964_v41 = vld [vmem:[#allocation2 + $0x288] sm:$0xff]  ;;  %v523_v47 = vld.sshfl [vmem:[#allocation1 + $0x8] sm:$0xff pattern:$0x75316420] }
  0x58   :  { %3357 = vst [vmem:[#allocation47_spill] sm:$0xff] %v2930_v44  ;;  %1438 = vmatpush.bf16.msra.mxu0 %v2934_v63  ;;  %1451 = vmatpush.bf16.msra.mxu1 %v2936_v35  ;;  %v524_v44 = vld.sshfl [vmem:[#allocation1 + $0x10] sm:$0xff pattern:$0x75316420]  ;;  %v2984_v31 = vld [vmem:[#allocation2 + $0x3b8] sm:$0xff] }
  0x59   :  { %519 = vst [vmem:[#allocation1 + $0x21] ss:$2 sm:$0xff] %v473_v50  ;;  %v2946_v50 = vld [vmem:[#allocation2 + $0x210] sm:$0xff]  ;;  %1464 = vmatpush.bf16.msra.mxu2 %v2940_v48  ;;  %1477 = vmatpush.bf16.msra.mxu3 %v2942_v39 }
  0x5a   :  { %3358 = vst [vmem:[#allocation48_spill] sm:$0xff] %v2934_v63  ;;  %v2972_v63 = vld [vmem:[#allocation2 + $0x280] sm:$0xff] }
  0x5b   :  { %3359 = vst [vmem:[#allocation49_spill] sm:$0xff] %v2936_v35  ;;  %v2970_v35 = vld [vmem:[#allocation2 + $0x240] sm:$0xff] }
  0x5c   :  { %3360 = vst [vmem:[#allocation50_spill] sm:$0xff] %v2940_v48  ;;  %1439 = vmatpush.bf16.msra.mxu0 %v2946_v50  ;;  %1452 = vmatpush.bf16.msra.mxu1 %v2948_v43  ;;  %v2966_v48 = vld [vmem:[#allocation2 + $0x2c8] sm:$0xff] }
  0x5d   :  { %3361 = vst [vmem:[#allocation51_spill] sm:$0xff] %v2942_v39  ;;  %1465 = vmatpush.bf16.msra.mxu2 %v2952_v62  ;;  %1478 = vmatpush.bf16.msra.mxu3 %v2954_v20  ;;  %v2968_v39 = vld [vmem:[#allocation2 + $0x200] sm:$0xff] }
  0x5e   :  { %3362 = vst [vmem:[#allocation52_spill] sm:$0xff] %v2946_v50  ;;  %v2978_v50 = vld [vmem:[#allocation2 + $0x338] sm:$0xff] }
  0x5f   :  { %3363 = vst [vmem:[#allocation53_spill] sm:$0xff] %v2948_v43  ;;  %v2976_v43 = vld [vmem:[#allocation2 + $0x2c0] sm:$0xff] }
  0x60   :  { %3364 = vst [vmem:[#allocation54_spill] sm:$0xff] %v2952_v62  ;;  %1440 = vmatpush.bf16.msra.mxu0 %v2958_v53  ;;  %1453 = vmatpush.bf16.msra.mxu1 %v2960_v40  ;;  %v2980_v62 = vld [vmem:[#allocation2 + $0x378] sm:$0xff] }
  0x61   :  { %3365 = vst [vmem:[#allocation55_spill] sm:$0xff] %v2954_v20  ;;  %1466 = vmatpush.bf16.msra.mxu2 %v2964_v41  ;;  %1479 = vmatpush.bf16.msra.mxu3 %v2966_v48  ;;  %v522_v20 = vld.sshfl [vmem:[#allocation1] sm:$0xff pattern:$0x75316420] }
  0x62   :  { %3366 = vst [vmem:[#allocation56_spill] sm:$0xff] %v2958_v53  ;;  %v556_v53 = vpack.c.bf16 %v524_v44, %v524_v44  ;;  %v3002_v44 = vld [vmem:[#allocation2 + $0x3f0] sm:$0xff] }
  0x63   :  { %3367 = vst [vmem:[#allocation57_spill] sm:$0xff] %v2960_v40  ;;  %v554_v40 = vpack.c.bf16 %v522_v20, %v522_v20  ;;  %v3000_v20 = vld [vmem:[#allocation2 + $0x3b0] sm:$0xff] }
  0x64   :  { %3368 = vst [vmem:[#allocation58_spill] sm:$0xff] %v2964_v41  ;;  %1441 = vmatpush.bf16.msra.mxu0 %v2968_v39  ;;  %1454 = vmatpush.bf16.msra.mxu1 %v2970_v35  ;;  %v555_v41 = vpack.c.bf16 %v523_v47, %v523_v47  ;;  %v3008_v47 = vld [vmem:[#allocation2 + $0x368] sm:$0xff] }
  0x65   :  { %3369 = vst [vmem:[#allocation59_spill] sm:$0xff] %v2966_v48  ;;  %1467 = vmatpush.bf16.msra.mxu2 %v2972_v63  ;;  %1480 = vmatpush.bf16.msra.mxu3 %v2976_v43  ;;  %v557_v48 = vpack.c.bf16 %v525_v46, %v525_v46  ;;  %v3006_v46 = vld [vmem:[#allocation2 + $0x328] sm:$0xff] }
  0x66   :  { %3370 = vst [vmem:[#allocation60_spill] sm:$0xff] %v2978_v50 }
  0x67   :  { %3371 = vst [vmem:[#allocation61_spill] sm:$0xff] %v2980_v62  ;;  %1442 = vmatmul.bf16.vlgmr.msra.gmra.mxu0 %v554_v40  ;;  %1455 = vmatmul.bf16.vlgmr.msra.gmra.mxu1 %v555_v41  ;;  %v3024_v40 = vld [vmem:[#allocation2 + $0x3a0] sm:$0xff] }
  0x68   :  { %3372 = vst [vmem:[#allocation62_spill] sm:$0xff] %v2984_v31  ;;  %1486 = vmatpush.bf16.msrb.mxu0 %v2978_v50  ;;  %1499 = vmatpush.bf16.msrb.mxu1 %v2980_v62  ;;  %v3026_v41 = vld [vmem:[#allocation2 + $0x3e0] sm:$0xff] }
  0x69   :  { %3373 = vst [vmem:[#allocation63_spill] sm:$0xff] %v2986_v55  ;;  %1512 = vmatpush.bf16.msrb.mxu2 %v2984_v31  ;;  %1525 = vmatpush.bf16.msrb.mxu3 %v2986_v55  ;;  %v3012_v55 = vld [vmem:[#allocation2 + $0x3a8] sm:$0xff] }
  0x6a   :  { %3374 = vst [vmem:[#allocation64_spill] sm:$0xff] %v2994_v37  ;;  %1468 = vmatmul.bf16.vlgmr.msra.gmra.mxu2 %v556_v53  ;;  %1481 = vmatmul.bf16.vlgmr.msra.gmra.mxu3 %v557_v48  ;;  %v3014_v31 = vld [vmem:[#allocation2 + $0x3e8] sm:$0xff]  ;;  %v3018_v48 = vld [vmem:[#allocation2 + $0x320] sm:$0xff] }
  0x6b   :  { %3375 = vst [vmem:[#allocation65_spill] sm:$0xff] %v2996_v23  ;;  %v3020_v53 = vld [vmem:[#allocation2 + $0x360] sm:$0xff] }
  0x6c   :  { %3376 = vst [vmem:[#allocation66_spill] sm:$0xff] %v3000_v20  ;;  %1487 = vmatpush.bf16.msrb.mxu0 %v2994_v37  ;;  %1500 = vmatpush.bf16.msrb.mxu1 %v2996_v23  ;;  %v527_v23 = vld.sshfl [vmem:[#allocation1 + $0x28] sm:$0xff pattern:$0x75316420] }
  0x6d   :  { %3377 = vst [vmem:[#allocation67_spill] sm:$0xff] %v3002_v44  ;;  %1513 = vmatpush.bf16.msrb.mxu2 %v3000_v20  ;;  %1526 = vmatpush.bf16.msrb.mxu3 %v3002_v44  ;;  %v3030_v44 = vld [vmem:[#allocation2 + $0x318] sm:$0xff]  ;;  %v3072_v20 = vld [vmem:[#allocation2 + $0x3c0] sm:$0xff]  ;;  %v529_v37 = vld.sshfl [vmem:[#allocation1 + $0x38] sm:$0xff pattern:$0x75316420]  ;;  %v559_v62 = vpack.c.bf16 %v527_v23, %v527_v23 }
  0x6e   :  { %3378 = vst [vmem:[#allocation68_spill] sm:$0xff] %v3006_v46  ;;  %v561_v50 = vpack.c.bf16 %v529_v37, %v529_v37 }
  0x6f   :  { %3379 = vst [vmem:[#allocation69_spill] sm:$0xff] %v3008_v47 }
  0x70   :  { %3380 = vst [vmem:[#allocation70_spill] sm:$0xff] %v3012_v55  ;;  %1488 = vmatpush.bf16.msrb.mxu0 %v3006_v46  ;;  %1501 = vmatpush.bf16.msrb.mxu1 %v3008_v47  ;;  %v3032_v46 = vld [vmem:[#allocation2 + $0x358] sm:$0xff] }
  0x71   :  { %3381 = vst [vmem:[#allocation71_spill] sm:$0xff] %v3014_v31  ;;  %1514 = vmatpush.bf16.msrb.mxu2 %v3012_v55  ;;  %1527 = vmatpush.bf16.msrb.mxu3 %v3014_v31  ;;  %v3036_v47 = vld [vmem:[#allocation2 + $0x398] sm:$0xff]  ;;  %v3042_v31 = vld [vmem:[#allocation2 + $0x310] sm:$0xff] }
  0x72   :  { %3382 = vst [vmem:[#allocation72_spill] sm:$0xff] %v3018_v48  ;;  %v3038_v55 = vld [vmem:[#allocation2 + $0x3d8] sm:$0xff] }
  0x73   :  { %3383 = vst [vmem:[#allocation73_spill] sm:$0xff] %v3020_v53 }
  0x74   :  { %3384 = vst [vmem:[#allocation74_spill] sm:$0xff] %v3024_v40  ;;  %1489 = vmatpush.bf16.msrb.mxu0 %v3018_v48  ;;  %1502 = vmatpush.bf16.msrb.mxu1 %v3020_v53  ;;  %v3044_v48 = vld [vmem:[#allocation2 + $0x350] sm:$0xff] }
  0x75   :  { %3385 = vst [vmem:[#allocation75_spill] sm:$0xff] %v3026_v41  ;;  %1515 = vmatpush.bf16.msrb.mxu2 %v3024_v40  ;;  %1528 = vmatpush.bf16.msrb.mxu3 %v3026_v41  ;;  %v3048_v53 = vld [vmem:[#allocation2 + $0x390] sm:$0xff]  ;;  %v3054_v41 = vld [vmem:[#allocation2 + $0x308] sm:$0xff] }
  0x76   :  { %3386 = vst [vmem:[#allocation76_spill] sm:$0xff] %v3030_v44  ;;  %v3050_v40 = vld [vmem:[#allocation2 + $0x3d0] sm:$0xff] }
  0x77   :  { %3387 = vst [vmem:[#allocation77_spill] sm:$0xff] %v3032_v46 }
  0x78   :  { %3388 = vst [vmem:[#allocation78_spill] sm:$0xff] %v3036_v47  ;;  %1490 = vmatpush.bf16.msrb.mxu0 %v3030_v44  ;;  %1503 = vmatpush.bf16.msrb.mxu1 %v3032_v46  ;;  %v3056_v44 = vld [vmem:[#allocation2 + $0x348] sm:$0xff] }
  0x79   :  { %3389 = vst [vmem:[#allocation79_spill] sm:$0xff] %v3038_v55  ;;  %1516 = vmatpush.bf16.msrb.mxu2 %v3036_v47  ;;  %1529 = vmatpush.bf16.msrb.mxu3 %v3038_v55  ;;  %v3060_v46 = vld [vmem:[#allocation2 + $0x388] sm:$0xff]  ;;  %v3064_v55 = vld [vmem:[#allocation2 + $0x300] sm:$0xff] }
  0x7a   :  { %3390 = vst [vmem:[#allocation80_spill] sm:$0xff] %v3042_v31  ;;  %v3062_v47 = vld [vmem:[#allocation2 + $0x3c8] sm:$0xff] }
  0x7b   :  { %3391 = vst [vmem:[#allocation81_spill] sm:$0xff] %v3044_v48 }
  0x7c   :  { %3392 = vst [vmem:[#allocation82_spill] sm:$0xff] %v3048_v53  ;;  %1491 = vmatpush.bf16.msrb.mxu0 %v3042_v31  ;;  %1504 = vmatpush.bf16.msrb.mxu1 %v3044_v48  ;;  %v3068_v31 = vld [vmem:[#allocation2 + $0x340] sm:$0xff] }
  0x7d   :  { %3393 = vst [vmem:[#allocation83_spill] sm:$0xff] %v3050_v40  ;;  %1517 = vmatpush.bf16.msrb.mxu2 %v3048_v53  ;;  %1530 = vmatpush.bf16.msrb.mxu3 %v3050_v40  ;;  %v3070_v48 = vld [vmem:[#allocation2 + $0x380] sm:$0xff]  ;;  %v526_v40 = vld.sshfl [vmem:[#allocation1 + $0x20] sm:$0xff pattern:$0x75316420] }
  0x7e   :  { %3394 = vst [vmem:[#allocation84_spill] sm:$0xff] %v3054_v41  ;;  %v528_v53 = vld.sshfl [vmem:[#allocation1 + $0x30] sm:$0xff pattern:$0x75316420] }
  0x7f   :  { %3395 = vst [vmem:[#allocation85_spill] sm:$0xff] %v3056_v44 }
  0x80   :  { %1492 = vmatpush.bf16.msrb.mxu0 %v3054_v41  ;;  %1505 = vmatpush.bf16.msrb.mxu1 %v3056_v44  ;;  %v558_v41 = vpack.c.bf16 %v526_v40, %v526_v40  ;;  %v560_v44 = vpack.c.bf16 %v528_v53, %v528_v53  ;;  %v3421_v53 = vld [vmem:[#allocation34_spill] sm:$0xff] }
  0x81   :  { %1518 = vmatpush.bf16.msrb.mxu2 %v3060_v46  ;;  %1531 = vmatpush.bf16.msrb.mxu3 %v3062_v47  ;;  %v3424_v40 = vld [vmem:[#allocation38_spill] sm:$0xff] }
  0x84   :  { %1493 = vmatpush.bf16.msrb.mxu0 %v3064_v55  ;;  %1506 = vmatpush.bf16.msrb.mxu1 %v3068_v31 }
  0x85   :  { %1519 = vmatpush.bf16.msrb.mxu2 %v3070_v48  ;;  %1532 = vmatpush.bf16.msrb.mxu3 %v3072_v20 }
  0x87   :  { %1494 = vmatmul.bf16.vlgmr.msrb.gmra.mxu0 %v558_v41  ;;  %1507 = vmatmul.bf16.vlgmr.msrb.gmra.mxu1 %v559_v62  ;;  %v3420_v62 = vld [vmem:[#allocation33_spill] sm:$0xff]  ;;  %v3425_v41 = vld [vmem:[#allocation39_spill] sm:$0xff] }
  0x88   :  { %1594 = vmatpush.bf16.msra.mxu0 %v2536_v0  ;;  %1607 = vmatpush.bf16.msra.mxu1 %v2538_v1  ;;  %v1546_v0 = vunpack.c.l.b16 %v2707_v54  ;;  %v1548_v1 = vunpack.c.l.b16 %v2685_v45 }
  0x89   :  { %1620 = vmatpush.bf16.msra.mxu2 %v2540_v2  ;;  %1633 = vmatpush.bf16.msra.mxu3 %v2542_v3  ;;  %v1547_v2 = vunpack.c.h.b16 %v2707_v54  ;;  %v1549_v3 = vunpack.c.h.b16 %v2685_v45  ;;  %v3415_v45 = vld [vmem:[#allocation18_spill] sm:$0xff] }
  0x8a   :  { %1520 = vmatmul.bf16.vlgmr.msrb.gmra.mxu2 %v560_v44  ;;  %1533 = vmatmul.bf16.vlgmr.msrb.gmra.mxu3 %v561_v50  ;;  %v1552_v54 = vunpack.c.l.b16 %v3415_v45  ;;  %v3419_v50 = vld [vmem:[#allocation32_spill] sm:$0xff] }
  0x8c   :  { %1595 = vmatpush.bf16.msra.mxu0 %v2546_v4  ;;  %1608 = vmatpush.bf16.msra.mxu1 %v2548_v5  ;;  %v3396_v4 = vld [vmem:[#allocation6_spill] sm:$0xff]  ;;  %v3397_v5 = vld [vmem:[#allocation7_spill] sm:$0xff] }
  0x8d   :  { %1621 = vmatpush.bf16.msra.mxu2 %v2552_v6  ;;  %1634 = vmatpush.bf16.msra.mxu3 %v2554_v7  ;;  %v1562_v6 = vpack.c.b16 %v1546_v0, %v1546_v0  ;;  %v1564_v7 = vpack.c.b16 %v1548_v1, %v1548_v1  ;;  %v3426_v0 = vld [vmem:[#allocation40_spill] sm:$0xff] }
  0x90   :  { %1596 = vmatpush.bf16.msra.mxu0 %v2558_v8  ;;  %1609 = vmatpush.bf16.msra.mxu1 %v2560_v9  ;;  %v3398_v8 = vld [vmem:[#allocation8_spill] sm:$0xff]  ;;  %v3399_v9 = vld [vmem:[#allocation9_spill] sm:$0xff] }
  0x91   :  { %1622 = vmatpush.bf16.msra.mxu2 %v2564_v10  ;;  %1635 = vmatpush.bf16.msra.mxu3 %v2566_v11  ;;  %v1563_v10 = vpack.c.b16 %v1547_v2, %v1547_v2  ;;  %v1565_v11 = vpack.c.b16 %v1549_v3, %v1549_v3 }
  0x94   :  { %1597 = vmatpush.bf16.msra.mxu0 %v2570_v12  ;;  %1610 = vmatpush.bf16.msra.mxu1 %v2572_v13  ;;  %v3400_v12 = vld [vmem:[#allocation10_spill] sm:$0xff]  ;;  %v3401_v13 = vld [vmem:[#allocation11_spill] sm:$0xff] }
  0x95   :  { %1623 = vmatpush.bf16.msra.mxu2 %v2576_v14  ;;  %1636 = vmatpush.bf16.msra.mxu3 %v2578_v15  ;;  %v3402_v14 = vld [vmem:[#allocation12_spill] sm:$0xff]  ;;  %v3403_v15 = vld [vmem:[#allocation13_spill] sm:$0xff] }
  0x98   :  { %1598 = vmatpush.bf16.msra.mxu0 %v2582_v16  ;;  %1611 = vmatpush.bf16.msra.mxu1 %v2584_v17  ;;  %v3404_v16 = vld [vmem:[#allocation14_spill] sm:$0xff]  ;;  %v3405_v17 = vld [vmem:[#allocation15_spill] sm:$0xff] }
  0x99   :  { %1624 = vmatpush.bf16.msra.mxu2 %v2588_v18  ;;  %1637 = vmatpush.bf16.msra.mxu3 %v2590_v19  ;;  %v3406_v18 = vld [vmem:[#allocation16_spill] sm:$0xff]  ;;  %v3407_v19 = vld [vmem:[#allocation17_spill] sm:$0xff] }
  0x9c   :  { %1599 = vmatpush.bf16.msra.mxu0 %v2599_v21  ;;  %1612 = vmatpush.bf16.msra.mxu1 %v2601_v22  ;;  %v3408_v21 = vld [vmem:[#allocation19_spill] sm:$0xff]  ;;  %v3409_v22 = vld [vmem:[#allocation20_spill] sm:$0xff] }
  0x9d   :  { %1625 = vmatpush.bf16.msra.mxu2 %v2611_v24  ;;  %1638 = vmatpush.bf16.msra.mxu3 %v2613_v25  ;;  %v3410_v24 = vld [vmem:[#allocation22_spill] sm:$0xff]  ;;  %v3411_v25 = vld [vmem:[#allocation23_spill] sm:$0xff] }
  0xa0   :  { %1600 = vmatpush.bf16.msra.mxu0 %v2634_v29  ;;  %1613 = vmatpush.bf16.msra.mxu1 %v2636_v30  ;;  %v3412_v29 = vld [vmem:[#allocation24_spill] sm:$0xff]  ;;  %v3413_v30 = vld [vmem:[#allocation25_spill] sm:$0xff] }
  0xa1   :  { %1626 = vmatpush.bf16.msra.mxu2 %v2646_v32  ;;  %1639 = vmatpush.bf16.msra.mxu3 %v2648_v33  ;;  %v3414_v32 = vld [vmem:[#allocation28_spill] sm:$0xff] }
  0xa2   :  { %v1550_v33 = vunpack.c.l.b16 %v3414_v32 }
  0xa4   :  { %1601 = vmatpush.bf16.msra.mxu0 %v3396_v4  ;;  %1614 = vmatpush.bf16.msra.mxu1 %v3397_v5  ;;  %v3427_v5 = vld [vmem:[#allocation41_spill] sm:$0xff] }
  0xa5   :  { %1627 = vmatpush.bf16.msra.mxu2 %v3398_v8  ;;  %1640 = vmatpush.bf16.msra.mxu3 %v3399_v9  ;;  %v3430_v8 = vld [vmem:[#allocation44_spill] sm:$0xff]  ;;  %v3431_v9 = vld [vmem:[#allocation45_spill] sm:$0xff] }
  0xa7   :  { %1602 = vmatmul.bf16.vlgmr.msra.gmra.mxu0 %v1562_v6  ;;  %1615 = vmatmul.bf16.vlgmr.msra.gmra.mxu1 %v1563_v10  ;;  %v3428_v6 = vld [vmem:[#allocation42_spill] sm:$0xff] }
  0xa8   :  { %1646 = vmatpush.bf16.msrb.mxu0 %v3400_v12  ;;  %1659 = vmatpush.bf16.msrb.mxu1 %v3401_v13  ;;  %v3432_v10 = vld [vmem:[#allocation46_spill] sm:$0xff] }
  0xa9   :  { %1672 = vmatpush.bf16.msrb.mxu2 %v3402_v14  ;;  %1685 = vmatpush.bf16.msrb.mxu3 %v3403_v15  ;;  %v3434_v14 = vld [vmem:[#allocation48_spill] sm:$0xff]  ;;  %v3435_v15 = vld [vmem:[#allocation49_spill] sm:$0xff] }
  0xaa   :  { %1628 = vmatmul.bf16.vlgmr.msra.gmra.mxu2 %v1564_v7  ;;  %1641 = vmatmul.bf16.vlgmr.msra.gmra.mxu3 %v1565_v11  ;;  %v3429_v7 = vld [vmem:[#allocation43_spill] sm:$0xff] }
  0xab   :  { %v3433_v11 = vld [vmem:[#allocation47_spill] sm:$0xff] }
  0xac   :  { %1647 = vmatpush.bf16.msrb.mxu0 %v3404_v16  ;;  %1660 = vmatpush.bf16.msrb.mxu1 %v3405_v17  ;;  %v3436_v16 = vld [vmem:[#allocation50_spill] sm:$0xff]  ;;  %v3437_v17 = vld [vmem:[#allocation51_spill] sm:$0xff] }
  0xad   :  { %1673 = vmatpush.bf16.msrb.mxu2 %v3406_v18  ;;  %1686 = vmatpush.bf16.msrb.mxu3 %v3407_v19 }
  0xb0   :  { %1648 = vmatpush.bf16.msrb.mxu0 %v3408_v21  ;;  %1661 = vmatpush.bf16.msrb.mxu1 %v3409_v22  ;;  %v3438_v22 = vld [vmem:[#allocation52_spill] sm:$0xff] }
  0xb1   :  { %1674 = vmatpush.bf16.msrb.mxu2 %v2762_v51  ;;  %1687 = vmatpush.bf16.msrb.mxu3 %v2764_v52  ;;  %v3416_v51 = vld [vmem:[#allocation29_spill] sm:$0xff]  ;;  %v3417_v52 = vld [vmem:[#allocation30_spill] sm:$0xff] }
  0xb4   :  { %1649 = vmatpush.bf16.msrb.mxu0 %v3410_v24  ;;  %1662 = vmatpush.bf16.msrb.mxu1 %v3411_v25  ;;  %v3439_v24 = vld [vmem:[#allocation53_spill] sm:$0xff] }
  0xb5   :  { %1675 = vmatpush.bf16.msrb.mxu2 %v3412_v29  ;;  %1688 = vmatpush.bf16.msrb.mxu3 %v3413_v30  ;;  %v3440_v29 = vld [vmem:[#allocation54_spill] sm:$0xff]  ;;  %v3441_v30 = vld [vmem:[#allocation55_spill] sm:$0xff] }
  0xb8   :  { %1650 = vmatpush.bf16.msrb.mxu0 %v2793_v27  ;;  %1663 = vmatpush.bf16.msrb.mxu1 %v2795_v57 }
  0xb9   :  { %1676 = vmatpush.bf16.msrb.mxu2 %v2802_v28  ;;  %1689 = vmatpush.bf16.msrb.mxu3 %v2804_v34  ;;  %v1566_v28 = vpack.c.b16 %v1550_v33, %v1550_v33  ;;  %v1568_v34 = vpack.c.b16 %v1552_v54, %v1552_v54  ;;  %v3442_v54 = vld [vmem:[#allocation56_spill] sm:$0xff] }
  0xbb   :  { %v1339_v27 = vpop.f32.mrf.mxu0  ;;  %v1352_v57 = vpop.f32.mrf.mxu1 }
  0xbc   :  { %1651 = vmatpush.bf16.msrb.mxu0 %v2814_v42  ;;  %1664 = vmatpush.bf16.msrb.mxu1 %v2816_v26  ;;  %v1551_v42 = vunpack.c.h.b16 %v3414_v32  ;;  %v1553_v26 = vunpack.c.h.b16 %v3415_v45  ;;  %v1365_v23 = vpop.f32.mrf.mxu2 }
  0xbd   :  { %1677 = vmatpush.bf16.msrb.mxu2 %v2823_v58  ;;  %1690 = vmatpush.bf16.msrb.mxu3 %v2825_v38  ;;  %v1353_v58 = vadd.f32 %v1352_v57, %v1339_v27  ;;  %v3418_v38 = vld [vmem:[#allocation31_spill] sm:$0xff]  ;;  %v1378_v37 = vpop.f32.mrf.mxu3  ;;  %v3446_v57 = vld [vmem:[#allocation58_spill] sm:$0xff] }
  0xbf   :  { %v1366_v44 = vadd.f32 %v1365_v23, %v1353_v58 }
  0xc0   :  { %1652 = vmatpush.bf16.msrb.mxu0 %v2846_v60  ;;  %1665 = vmatpush.bf16.msrb.mxu1 %v2848_v61  ;;  %v1567_v60 = vpack.c.b16 %v1551_v42, %v1551_v42  ;;  %v1569_v61 = vpack.c.b16 %v1553_v26, %v1553_v26  ;;  %v3445_v26 = vld [vmem:[#allocation21_spill] sm:$0xff] }
  0xc1   :  { %1678 = vmatpush.bf16.msrb.mxu2 %v3416_v51  ;;  %1691 = vmatpush.bf16.msrb.mxu3 %v3417_v52  ;;  %v3443_v51 = vld [vmem:[#allocation57_spill] sm:$0xff]  ;;  %v3444_v52 = vld [vmem:[#allocation26_spill] sm:$0xff]  ;;  %v1556_v27 = vunpack.c.l.b16 %v3445_v26  ;;  %v1557_v58 = vunpack.c.h.b16 %v3445_v26 }
  0xc2   :  { %v1554_v42 = vunpack.c.l.b16 %v3444_v52 }
  0xc3   :  { %v1341_v1 = vpop.f32.mrf.mxu0  ;;  %v1354_v2 = vpop.f32.mrf.mxu1  ;;  %v1572_v23 = vpack.c.b16 %v1556_v27, %v1556_v27 }
  0xc4   :  { %1653 = vmatpush.bf16.msrb.mxu0 %v2862_v36  ;;  %1666 = vmatpush.bf16.msrb.mxu1 %v2864_v49  ;;  %v3422_v36 = vld [vmem:[#allocation35_spill] sm:$0xff]  ;;  %v1379_v49 = vadd.f32 %v1378_v37, %v1366_v44  ;;  %v1367_v3 = vpop.f32.mrf.mxu2  ;;  %v3449_v44 = vld [vmem:[#allocation61_spill] sm:$0xff]  ;;  %v3458_v1 = vld [vmem:[#allocation70_spill] sm:$0xff] }
  0xc5   :  { %1679 = vmatpush.bf16.msrb.mxu2 %v2870_v59  ;;  %1692 = vmatpush.bf16.msrb.mxu3 %v3418_v38  ;;  %v3423_v59 = vld [vmem:[#allocation37_spill] sm:$0xff]  ;;  %v1380_v4 = vpop.f32.mrf.mxu3  ;;  %v3459_v2 = vld [vmem:[#allocation71_spill] sm:$0xff] }
  0xc6   :  { %v3460_v4 = vld [vmem:[#allocation72_spill] sm:$0xff] }
  0xc7   :  { %1654 = vmatmul.bf16.vlgmr.msrb.gmra.mxu0 %v1566_v28  ;;  %1667 = vmatmul.bf16.vlgmr.msrb.gmra.mxu1 %v1567_v60  ;;  %v3447_v28 = vld [vmem:[#allocation59_spill] sm:$0xff] }
  0xc8   :  { %1698 = vmatpush.bf16.msra.mxu0 %v3419_v50  ;;  %1711 = vmatpush.bf16.msra.mxu1 %v3420_v62  ;;  %v1573_v50 = vpack.c.b16 %v1557_v58, %v1557_v58  ;;  %v3448_v62 = vld [vmem:[#allocation60_spill] sm:$0xff] }
  0xc9   :  { %1724 = vmatpush.bf16.msra.mxu2 %v3421_v53  ;;  %1737 = vmatpush.bf16.msra.mxu3 %v3422_v36  ;;  %v3450_v53 = vld [vmem:[#allocation62_spill] sm:$0xff]  ;;  %v3451_v36 = vld [vmem:[#allocation63_spill] sm:$0xff] }
  0xca   :  { %1680 = vmatmul.bf16.vlgmr.msrb.gmra.mxu2 %v1568_v34  ;;  %1693 = vmatmul.bf16.vlgmr.msrb.gmra.mxu3 %v1569_v61  ;;  %v1555_v34 = vunpack.c.h.b16 %v3444_v52  ;;  %v1570_v61 = vpack.c.b16 %v1554_v42, %v1554_v42 }
  0xcc   :  { %1699 = vmatpush.bf16.msra.mxu0 %v3423_v59  ;;  %1712 = vmatpush.bf16.msra.mxu1 %v3424_v40  ;;  %v1417_v18 = vpop.f32.mrf.mxu2  ;;  %v1571_v37 = vpack.c.b16 %v1555_v34, %v1555_v34  ;;  %v3456_v59 = vld [vmem:[#allocation68_spill] sm:$0xff]  ;;  %v3457_v40 = vld [vmem:[#allocation69_spill] sm:$0xff] }
  0xcd   :  { %1725 = vmatpush.bf16.msra.mxu2 %v3425_v41  ;;  %1738 = vmatpush.bf16.msra.mxu3 %v3426_v0 }
  0xcf   :  { %v1430_v19 = vpop.f32.mrf.mxu3 }
  0xd0   :  { %1700 = vmatpush.bf16.msra.mxu0 %v2906_v56  ;;  %1713 = vmatpush.bf16.msra.mxu1 %v3427_v5  ;;  %v3461_v5 = vld [vmem:[#allocation73_spill] sm:$0xff] }
  0xd1   :  { %1726 = vmatpush.bf16.msra.mxu2 %v3428_v6  ;;  %1739 = vmatpush.bf16.msra.mxu3 %v3429_v7  ;;  %v3462_v6 = vld [vmem:[#allocation74_spill] sm:$0xff]  ;;  %v3463_v7 = vld [vmem:[#allocation75_spill] sm:$0xff] }
  0xd4   :  { %1701 = vmatpush.bf16.msra.mxu0 %v3430_v8  ;;  %1714 = vmatpush.bf16.msra.mxu1 %v3431_v9  ;;  %v1391_v12 = vpop.f32.mrf.mxu0  ;;  %v1404_v13 = vpop.f32.mrf.mxu1 }
  0xd5   :  { %1727 = vmatpush.bf16.msra.mxu2 %v3432_v10  ;;  %1740 = vmatpush.bf16.msra.mxu3 %v3433_v11  ;;  %v1392_v56 = vadd.f32 %v1391_v12, %v1379_v49  ;;  %v1419_v38 = vpop.f32.mrf.mxu2  ;;  %v3464_v12 = vld [vmem:[#allocation76_spill] sm:$0xff] }
  0xd7   :  { %v1405_v21 = vadd.f32 %v1404_v13, %v1392_v56  ;;  %v1432_v60 = vpop.f32.mrf.mxu3  ;;  %v3465_v13 = vld [vmem:[#allocation77_spill] sm:$0xff]  ;;  %v3466_v56 = vld [vmem:[#allocation78_spill] sm:$0xff] }
  0xd8   :  { %1702 = vmatpush.bf16.msra.mxu0 %v3434_v14  ;;  %1715 = vmatpush.bf16.msra.mxu1 %v3435_v15 }
  0xd9   :  { %1728 = vmatpush.bf16.msra.mxu2 %v3436_v16  ;;  %1741 = vmatpush.bf16.msra.mxu3 %v3437_v17  ;;  %v1418_v25 = vadd.f32 %v1417_v18, %v1405_v21  ;;  %v3467_v16 = vld [vmem:[#allocation79_spill] sm:$0xff]  ;;  %v3468_v17 = vld [vmem:[#allocation80_spill] sm:$0xff]  ;;  %v3469_v18 = vld [vmem:[#allocation81_spill] sm:$0xff] }
  0xda   :  { %v3471_v21 = vld [vmem:[#allocation83_spill] sm:$0xff] }
  0xdb   :  { %v1431_v32 = vadd.f32 %v1430_v19, %v1418_v25  ;;  %v3470_v19 = vld [vmem:[#allocation82_spill] sm:$0xff]  ;;  %v3472_v25 = vld [vmem:[#allocation36_spill] sm:$0xff] }
  0xdc   :  { %1703 = vmatpush.bf16.msra.mxu0 %v3438_v22  ;;  %1716 = vmatpush.bf16.msra.mxu1 %v3439_v24  ;;  %v1393_v33 = vpop.f32.mrf.mxu0  ;;  %v1406_v45 = vpop.f32.mrf.mxu1 }
  0xdd   :  { %1729 = vmatpush.bf16.msra.mxu2 %v3440_v29  ;;  %1742 = vmatpush.bf16.msra.mxu3 %v3441_v30  ;;  %v1558_v29 = vunpack.c.l.b16 %v3472_v25  ;;  %v1559_v30 = vunpack.c.h.b16 %v3472_v25  ;;  %v3474_v33 = vld [vmem:[#allocation85_spill] sm:$0xff]  ;;  %v3475_v45 = vld [vmem:[#allocation27_spill] sm:$0xff] }
  0xdf   :  { %v1574_v52 = vpack.c.b16 %v1558_v29, %v1558_v29  ;;  %v1575_v42 = vpack.c.b16 %v1559_v30, %v1559_v30 }
  0xe0   :  { %1704 = vmatpush.bf16.msra.mxu0 %v3442_v54  ;;  %1717 = vmatpush.bf16.msra.mxu1 %v3443_v51  ;;  %v1560_v54 = vunpack.c.l.b16 %v3475_v45  ;;  %v1561_v51 = vunpack.c.h.b16 %v3475_v45 }
  0xe1   :  { %1730 = vmatpush.bf16.msra.mxu2 %v3446_v57  ;;  %1743 = vmatpush.bf16.msra.mxu3 %v3447_v28 }
  0xe2   :  { %v1576_v26 = vpack.c.b16 %v1560_v54, %v1560_v54  ;;  %v1577_v27 = vpack.c.b16 %v1561_v51, %v1561_v51 }
  0xe4   :  { %1705 = vmatpush.bf16.msra.mxu0 %v2968_v39  ;;  %1718 = vmatpush.bf16.msra.mxu1 %v2970_v35  ;;  %v3452_v35 = vld [vmem:[#allocation64_spill] sm:$0xff]  ;;  %v3453_v39 = vld [vmem:[#allocation65_spill] sm:$0xff]  ;;  %v1443_v49 = vpop.f32.mrf.mxu0  ;;  %v1456_v0 = vpop.f32.mrf.mxu1 }
  0xe5   :  { %1731 = vmatpush.bf16.msra.mxu2 %v2972_v63  ;;  %1744 = vmatpush.bf16.msra.mxu3 %v2976_v43  ;;  %v3454_v63 = vld [vmem:[#allocation66_spill] sm:$0xff]  ;;  %v3455_v43 = vld [vmem:[#allocation67_spill] sm:$0xff]  ;;  %v1444_v41 = vadd.f32 %v1443_v49, %v1431_v32  ;;  %v3473_v32 = vld [vmem:[#allocation84_spill] sm:$0xff] }
  0xe7   :  { %1706 = vmatmul.bf16.vlgmr.msra.gmra.mxu0 %v1570_v61  ;;  %1719 = vmatmul.bf16.vlgmr.msra.gmra.mxu1 %v1571_v37  ;;  %v1457_v3 = vadd.f32 %v1456_v0, %v1444_v41 }
  0xe8   :  { %1750 = vmatpush.bf16.msrb.mxu0 %v3448_v62  ;;  %1763 = vmatpush.bf16.msrb.mxu1 %v3449_v44 }
  0xe9   :  { %1776 = vmatpush.bf16.msrb.mxu2 %v3450_v53  ;;  %1789 = vmatpush.bf16.msrb.mxu3 %v3451_v36 }
  0xea   :  { %1732 = vmatmul.bf16.vlgmr.msra.gmra.mxu2 %v1572_v23  ;;  %1745 = vmatmul.bf16.vlgmr.msra.gmra.mxu3 %v1573_v50 }
  0xec   :  { %1751 = vmatpush.bf16.msrb.mxu0 %v3452_v35  ;;  %1764 = vmatpush.bf16.msrb.mxu1 %v3453_v39  ;;  %v1445_v11 = vpop.f32.mrf.mxu0  ;;  %v1458_v15 = vpop.f32.mrf.mxu1 }
  0xed   :  { %1777 = vmatpush.bf16.msrb.mxu2 %v3454_v63  ;;  %1790 = vmatpush.bf16.msrb.mxu3 %v3455_v43  ;;  %v1469_v8 = vpop.f32.mrf.mxu2  ;;  %v1482_v10 = vpop.f32.mrf.mxu3 }
  0xee   :  { %v1470_v9 = vadd.f32 %v1469_v8, %v1457_v3 }
  0xf0   :  { %1752 = vmatpush.bf16.msrb.mxu0 %v3456_v59  ;;  %1765 = vmatpush.bf16.msrb.mxu1 %v3457_v40  ;;  %v1483_v14 = vadd.f32 %v1482_v10, %v1470_v9 }
  0xf1   :  { %1778 = vmatpush.bf16.msrb.mxu2 %v3458_v1  ;;  %1791 = vmatpush.bf16.msrb.mxu3 %v3459_v2 }
  0xf4   :  { %1753 = vmatpush.bf16.msrb.mxu0 %v3460_v4  ;;  %1766 = vmatpush.bf16.msrb.mxu1 %v3461_v5 }
  0xf5   :  { %1779 = vmatpush.bf16.msrb.mxu2 %v3462_v6  ;;  %1792 = vmatpush.bf16.msrb.mxu3 %v3463_v7  ;;  %v1471_v22 = vpop.f32.mrf.mxu2  ;;  %v1484_v24 = vpop.f32.mrf.mxu3 }
  0xf8   :  { %1754 = vmatpush.bf16.msrb.mxu0 %v3464_v12  ;;  %1767 = vmatpush.bf16.msrb.mxu1 %v3465_v13 }
  0xf9   :  { %1780 = vmatpush.bf16.msrb.mxu2 %v3466_v56  ;;  %1793 = vmatpush.bf16.msrb.mxu3 %v3467_v16 }
  0xfc   :  { %1755 = vmatpush.bf16.msrb.mxu0 %v3468_v17  ;;  %1768 = vmatpush.bf16.msrb.mxu1 %v3469_v18 }
  0xfd   :  { %1781 = vmatpush.bf16.msrb.mxu2 %v3470_v19  ;;  %1794 = vmatpush.bf16.msrb.mxu3 %v3471_v21 }
 0x100   :  { %1756 = vmatpush.bf16.msrb.mxu0 %v3473_v32  ;;  %1769 = vmatpush.bf16.msrb.mxu1 %v3474_v33 }
 0x101   :  { %1782 = vmatpush.bf16.msrb.mxu2 %v3060_v46  ;;  %1795 = vmatpush.bf16.msrb.mxu3 %v3062_v47 }
 0x104   :  { %1757 = vmatpush.bf16.msrb.mxu0 %v3064_v55  ;;  %1770 = vmatpush.bf16.msrb.mxu1 %v3068_v31  ;;  %v1495_v57 = vpop.f32.mrf.mxu0  ;;  %v1508_v28 = vpop.f32.mrf.mxu1 }
 0x105   :  { %1783 = vmatpush.bf16.msrb.mxu2 %v3070_v48  ;;  %1796 = vmatpush.bf16.msrb.mxu3 %v3072_v20  ;;  %v1496_v46 = vadd.f32 %v1495_v57, %v1483_v14 }
 0x107   :  { %1758 = vmatmul.bf16.vlgmr.msrb.gmra.mxu0 %v1574_v52  ;;  %1771 = vmatmul.bf16.vlgmr.msrb.gmra.mxu1 %v1575_v42  ;;  %v1509_v47 = vadd.f32 %v1508_v28, %v1496_v46 }
 0x108   :  { %1784 = vmatmul.bf16.vlgmr.msrb.gmra.mxu2 %v1576_v26  ;;  %1797 = vmatmul.bf16.vlgmr.msrb.gmra.mxu3 %v1577_v27 }
 0x10c   :  { %v1497_v55 = vpop.f32.mrf.mxu0  ;;  %v1510_v31 = vpop.f32.mrf.mxu1 }
 0x10d   :  { %v1521_v34 = vpop.f32.mrf.mxu2  ;;  %v1534_v38 = vpop.f32.mrf.mxu3 }
 0x10e   :  { %v1522_v58 = vadd.f32 %v1521_v34, %v1509_v47 }
 0x110   :  { %v1535_v60 = vadd.f32 %v1534_v38, %v1522_v58 }
 0x115   :  { %v1523_v61 = vpop.f32.mrf.mxu2  ;;  %v1536_v23 = vpop.f32.mrf.mxu3 }
 0x124   :  { %v1603_v37 = vpop.f32.mrf.mxu0  ;;  %v1616_v50 = vpop.f32.mrf.mxu1 }
 0x125   :  { %v1604_v48 = vadd.f32 %v1603_v37, %v1535_v60 }
 0x127   :  { %v1617_v20 = vadd.f32 %v1616_v50, %v1604_v48 }
 0x12c   :  { %v1605_v36 = vpop.f32.mrf.mxu0  ;;  %v1618_v39 = vpop.f32.mrf.mxu1 }
 0x12d   :  { %v1629_v62 = vpop.f32.mrf.mxu2  ;;  %v1642_v53 = vpop.f32.mrf.mxu3 }
 0x12e   :  { %v1630_v44 = vadd.f32 %v1629_v62, %v1617_v20 }
 0x130   :  { %v1643_v35 = vadd.f32 %v1642_v53, %v1630_v44 }
 0x135   :  { %v1631_v63 = vpop.f32.mrf.mxu2  ;;  %v1644_v43 = vpop.f32.mrf.mxu3 }
 0x144   :  { %v1655_v49 = vpop.f32.mrf.mxu0  ;;  %v1668_v59 = vpop.f32.mrf.mxu1 }
 0x145   :  { %v1656_v7 = vadd.f32 %v1655_v49, %v1643_v35 }
 0x147   :  { %v1669_v11 = vadd.f32 %v1668_v59, %v1656_v7 }
 0x14c   :  { %v1657_v0 = vpop.f32.mrf.mxu0  ;;  %v1670_v1 = vpop.f32.mrf.mxu1 }
 0x14d   :  { %v1681_v40 = vpop.f32.mrf.mxu2  ;;  %v1694_v41 = vpop.f32.mrf.mxu3 }
 0x14e   :  { %v1682_v12 = vadd.f32 %v1681_v40, %v1669_v11 }
 0x150   :  { %v1695_v15 = vadd.f32 %v1694_v41, %v1682_v12 }
 0x155   :  { %v1683_v2 = vpop.f32.mrf.mxu2  ;;  %v1696_v3 = vpop.f32.mrf.mxu3 }
 0x164   :  { %v1707_v4 = vpop.f32.mrf.mxu0  ;;  %v1720_v5 = vpop.f32.mrf.mxu1 }
 0x165   :  { %v1708_v56 = vadd.f32 %v1707_v4, %v1695_v15 }
 0x167   :  { %v1721_v16 = vadd.f32 %v1720_v5, %v1708_v56 }
 0x16c   :  { %v1709_v9 = vpop.f32.mrf.mxu0  ;;  %v1722_v10 = vpop.f32.mrf.mxu1 }
 0x16d   :  { %v1733_v6 = vpop.f32.mrf.mxu2  ;;  %v1746_v8 = vpop.f32.mrf.mxu3 }
 0x16e   :  { %v1734_v17 = vadd.f32 %v1733_v6, %v1721_v16 }
 0x170   :  { %v1747_v18 = vadd.f32 %v1746_v8, %v1734_v17 }
 0x175   :  { %v1735_v13 = vpop.f32.mrf.mxu2  ;;  %v1748_v14 = vpop.f32.mrf.mxu3 }
 0x184   :  { %v1759_v19 = vpop.f32.mrf.mxu0  ;;  %v1772_v21 = vpop.f32.mrf.mxu1 }
 0x185   :  { %v1760_v22 = vadd.f32 %v1759_v19, %v1747_v18 }
 0x187   :  { %v1773_v24 = vadd.f32 %v1772_v21, %v1760_v22 }
 0x18b   :  { %v1785_v25 = vpop.f32.mrf.mxu2  ;;  %v1798_v29 = vpop.f32.mrf.mxu3 }
 0x18c   :  { %v1786_v30 = vadd.f32 %v1785_v25, %v1773_v24  ;;  %v1761_v32 = vpop.f32.mrf.mxu0  ;;  %v1774_v33 = vpop.f32.mrf.mxu1 }
 0x18e   :  { %v1799_v45 = vadd.f32 %v1798_v29, %v1786_v30 }
 0x190   :  { %v1802_v54 = vmax.f32 %v1799_v45, 0.0 }
 0x192   :  { %1803 = vst [vmem:[#allocation4] sm:$0xff] %v1802_v54 }
 0x193   :  { %v1787_v51 = vpop.f32.mrf.mxu2  ;;  %v1800_v52 = vpop.f32.mrf.mxu3 }
 0x199   :  { %v1822_v42 = vld [vmem:[#allocation4] sm:$0xf] }
 0x19a   :  { %1823 = vst [vmem:[%s3229_s2] sm:$0xf] %v1822_v42 }
 0x19b   :  { %1841 = vsyncpa [#allocation3], 1 }

</bundles_post_ra>
